<compile_context>
chip_gen: v6e
topology: v6e:2x2x1
jax: 0.10.0
libtpu: 0.0.40
codegen_flags: <defaults>
</compile_context>

<pallas_src>
import math

import jax
import jax.numpy as jnp
from jax.experimental import pallas as pl
from jax.experimental.pallas import tpu as pltpu

# ----------------------- model hyper-params (small) -----------------------
VOCAB = 100
HIDDEN = 32
NUM_HEADS = 2
HEAD_DIM = HIDDEN // NUM_HEADS
INTERMEDIATE = 64
NUM_LAYERS = 2
MAX_POS = 32
LN_EPS = 1e-12


def _gelu(x):
    # TODO(synk): HF BERT uses exact erf-GELU; tanh approximation used here.
    return 0.5 * x * (1.0 + jnp.tanh(0.7978845608028654 * (x + 0.044715 * x * x * x)))


# ------------------------------ fused Pallas kernel -----------------------
def fused_forward_kernel(
    x_ref, bias_ref,
    emb_g_ref, emb_b_ref,
    wqkv_ref, bqkv_ref, wo_ref, bo_ref, ln1_g_ref, ln1_b_ref,
    wi_ref, bi_ref, wf_ref, bf_ref, ln2_g_ref, ln2_b_ref,
    pool_w_ref, pool_b_ref,
    pooled_ref,
    x_scr,
):
    S, H = x_scr.shape
    nH = NUM_HEADS
    Dh = H // nH
    layer = pl.program_id(1)

    def ln(z, g, b):
        mu = jnp.mean(z, axis=-1, keepdims=True)
        var = jnp.mean(jnp.square(z - mu), axis=-1, keepdims=True)
        return (z - mu) * jax.lax.rsqrt(var + LN_EPS) * g + b

    # ---- embeddings LayerNorm (once per batch block); x then lives in VMEM ----
    @pl.when(layer == 0)
    def _():
        x_scr[...] = ln(x_ref[0], emb_g_ref[...], emb_b_ref[...])

    x = x_scr[...]                                               # (S, H) f32

    # ---- self-attention ----
    # fused QKV projection: (S, H) @ (H, 3H); Q pre-scaled by 1/sqrt(Dh).
    qkv = jnp.dot(x.astype(jnp.bfloat16), wqkv_ref[0],
                  preferred_element_type=jnp.float32) + bqkv_ref[0]   # (S, 3H) f32

    # additive HF mask bias, broadcast ONCE per layer step (hoisted).
    bias_mat = jnp.broadcast_to(bias_ref[0], (S, S))             # (S, S) f32

    wo_full = wo_ref[0]                                          # (H, H) bf16
    acc = jnp.zeros((S, H), jnp.float32)
    # tiny static head loop (batch already on the grid); head merge is folded
    # into the output projection: sum_h (p_h @ v_h) @ Wo[h]  -> no concatenate.
    for h in range(nH):
        c0 = h * Dh
        qh = qkv[:, c0:c0 + Dh].astype(jnp.bfloat16)             # (S, Dh)
        kh = qkv[:, H + c0:H + c0 + Dh].astype(jnp.bfloat16)
        vh = qkv[:, 2 * H + c0:2 * H + c0 + Dh].astype(jnp.bfloat16)

        s = jax.lax.dot_general(qh, kh, (((1,), (1,)), ((), ())),
                                preferred_element_type=jnp.float32)   # (S, S)
        s = s + bias_mat
        s = s - jnp.max(s, axis=-1, keepdims=True)
        p = jnp.exp(s)
        p = p * pl.reciprocal(jnp.sum(p, axis=-1, keepdims=True), approx=True)

        ctx = jnp.dot(p.astype(jnp.bfloat16), vh,
                      preferred_element_type=jnp.float32)        # (S, Dh)
        acc = acc + jnp.dot(ctx.astype(jnp.bfloat16), wo_full[c0:c0 + Dh, :],
                            preferred_element_type=jnp.float32)  # (S, H)

    x = ln(x + acc + bo_ref[0], ln1_g_ref[0], ln1_b_ref[0])

    # ---- FFN: GELU(x @ Wi + bi) @ Wf + bf, residual + LN ----
    h_mid = _gelu(jnp.dot(x.astype(jnp.bfloat16), wi_ref[0],
                          preferred_element_type=jnp.float32) + bi_ref[0])
    ffn = jnp.dot(h_mid.astype(jnp.bfloat16), wf_ref[0],
                  preferred_element_type=jnp.float32) + bf_ref[0]
    x = ln(x + ffn, ln2_g_ref[0], ln2_b_ref[0])

    x_scr[...] = x

    # ---- pooler on the [CLS] row (row slice, no concatenate) ----
    @pl.when(layer == pl.num_programs(1) - 1)
    def _():
        cls = x[0:1, :]                                          # (1, H)
        pooled = jnp.tanh(jnp.dot(cls.astype(jnp.bfloat16), pool_w_ref[...],
                                  preferred_element_type=jnp.float32)
                          + pool_b_ref[...])
        pooled_ref[0] = pooled.astype(pooled_ref.dtype)


def _fused_call(x_emb, attn_bias, packed):
    B, S, H = x_emb.shape
    L = packed["wqkv"].shape[0]

    def rep(a):
        shape = a.shape
        return pl.BlockSpec(shape, lambda b, l: (0,) * len(shape))

    def per_batch(a):
        shape = (1,) + a.shape[1:]
        return pl.BlockSpec(shape, lambda b, l: (b,) + (0,) * (len(shape) - 1))

    def per_layer(a):
        shape = (1,) + a.shape[1:]
        return pl.BlockSpec(shape, lambda b, l: (l,) + (0,) * (len(shape) - 1))

    args = (
        x_emb, attn_bias,
        packed["emb_ln_g"], packed["emb_ln_b"],
        packed["wqkv"], packed["bqkv"], packed["wo"], packed["bo"],
        packed["ln1_g"], packed["ln1_b"],
        packed["wi"], packed["bi"], packed["wf"], packed["bf"],
        packed["ln2_g"], packed["ln2_b"],
        packed["pool_w"], packed["pool_b"],
    )
    in_specs = [
        per_batch(x_emb), per_batch(attn_bias),
        rep(packed["emb_ln_g"]), rep(packed["emb_ln_b"]),
        per_layer(packed["wqkv"]), per_layer(packed["bqkv"]),
        per_layer(packed["wo"]), per_layer(packed["bo"]),
        per_layer(packed["ln1_g"]), per_layer(packed["ln1_b"]),
        per_layer(packed["wi"]), per_layer(packed["bi"]),
        per_layer(packed["wf"]), per_layer(packed["bf"]),
        per_layer(packed["ln2_g"]), per_layer(packed["ln2_b"]),
        rep(packed["pool_w"]), rep(packed["pool_b"]),
    ]

    return pl.pallas_call(
        fused_forward_kernel,
        out_shape=jax.ShapeDtypeStruct((B, 1, H), jnp.float32),
        grid=(B, L),
        in_specs=in_specs,
        out_specs=pl.BlockSpec((1, 1, H), lambda b, l: (b, 0, 0)),
        scratch_shapes=[pltpu.VMEM((S, H), jnp.float32)],
        compiler_params=pltpu.CompilerParams(
            dimension_semantics=("parallel", "arbitrary"),
            vmem_limit_bytes=32 * 1024 * 1024),
    )(*args)


# ------------------------------ parameter init ------------------------------
def init_params(key):
    keys = iter(jax.random.split(key, 64))

    def nrm(shape):
        return (0.02 * jax.random.normal(next(keys), shape)).astype(jnp.float32)

    p = {
        "word_emb": nrm((VOCAB, HIDDEN)),
        "pos_emb": nrm((MAX_POS, HIDDEN)),
        "type_emb": nrm((2, HIDDEN)),
        "emb_ln_g": jnp.ones((HIDDEN,), jnp.float32),
        "emb_ln_b": jnp.zeros((HIDDEN,), jnp.float32),
        "layers": [],
        "pool_w": nrm((HIDDEN, HIDDEN)),
        "pool_b": jnp.zeros((HIDDEN,), jnp.float32),
        "fc_w": nrm((1, HIDDEN)),
        "fc_b": jnp.zeros((1,), jnp.float32),
    }
    for _ in range(NUM_LAYERS):
        p["layers"].append({
            "wq": nrm((HIDDEN, HIDDEN)), "bq": jnp.zeros((HIDDEN,), jnp.float32),
            "wk": nrm((HIDDEN, HIDDEN)), "bk": jnp.zeros((HIDDEN,), jnp.float32),
            "wv": nrm((HIDDEN, HIDDEN)), "bv": jnp.zeros((HIDDEN,), jnp.float32),
            "wo": nrm((HIDDEN, HIDDEN)), "bo": jnp.zeros((HIDDEN,), jnp.float32),
            "ln1_g": jnp.ones((HIDDEN,), jnp.float32),
            "ln1_b": jnp.zeros((HIDDEN,), jnp.float32),
            "wi": nrm((INTERMEDIATE, HIDDEN)), "bi": jnp.zeros((INTERMEDIATE,), jnp.float32),
            "wf": nrm((HIDDEN, INTERMEDIATE)), "bf": jnp.zeros((HIDDEN,), jnp.float32),
            "ln2_g": jnp.ones((HIDDEN,), jnp.float32),
            "ln2_b": jnp.zeros((HIDDEN,), jnp.float32),
        })
    return p


def pack_params(params):
    """One-time prep: stack layers (leading L dim for per-layer BlockSpecs),
    pre-transpose (out,in)->(in,out), fuse QKV, fold 1/sqrt(Dh) into Q, cast
    matmul weights to bf16 (MXU operands); biases/LN params stay f32."""
    scale = 1.0 / math.sqrt(HEAD_DIM)
    bf16 = jnp.bfloat16

    def stack(fn):
        return jnp.stack([fn(lp) for lp in params["layers"]], axis=0)

    return {
        "word_emb": params["word_emb"],
        "pos_emb": params["pos_emb"],
        "type_emb": params["type_emb"],
        "emb_ln_g": params["emb_ln_g"].reshape(1, HIDDEN),
        "emb_ln_b": params["emb_ln_b"].reshape(1, HIDDEN),
        "wqkv": stack(lambda lp: jnp.concatenate(
            [lp["wq"] * scale, lp["wk"], lp["wv"]], axis=0).T.astype(bf16)),   # (L,H,3H)
        "bqkv": stack(lambda lp: jnp.concatenate(
            [lp["bq"] * scale, lp["bk"], lp["bv"]]).reshape(1, 3 * HIDDEN)),   # (L,1,3H)
        "wo": stack(lambda lp: lp["wo"].T.astype(bf16)),                       # (L,H,H)
        "bo": stack(lambda lp: lp["bo"].reshape(1, HIDDEN)),
        "ln1_g": stack(lambda lp: lp["ln1_g"].reshape(1, HIDDEN)),
        "ln1_b": stack(lambda lp: lp["ln1_b"].reshape(1, HIDDEN)),
        "wi": stack(lambda lp: lp["wi"].T.astype(bf16)),                       # (L,H,I)
        "bi": stack(lambda lp: lp["bi"].reshape(1, INTERMEDIATE)),
        "wf": stack(lambda lp: lp["wf"].T.astype(bf16)),                       # (L,I,H)
        "bf": stack(lambda lp: lp["bf"].reshape(1, HIDDEN)),
        "ln2_g": stack(lambda lp: lp["ln2_g"].reshape(1, HIDDEN)),
        "ln2_b": stack(lambda lp: lp["ln2_b"].reshape(1, HIDDEN)),
        "pool_w": params["pool_w"].T.astype(bf16),                             # (H,H)
        "pool_b": params["pool_b"].reshape(1, HIDDEN),
        "fc_w_t": params["fc_w"].T,                                            # (H,1)
        "fc_b": params["fc_b"].reshape(1, 1),
    }


# -------------------------------- forward pass -------------------------------
def anime_rating_forward(packed, input_ids, attention_mask):
    B, S = input_ids.shape

    # BERT embeddings: data-dependent gather stays as wrapper glue.
    tok = jnp.take(packed["word_emb"], input_ids, axis=0)              # (B, S, H)
    pos = packed["pos_emb"][:S][None, :, :]                            # (1, S, H)
    typ = packed["type_emb"][0][None, None, :]                         # token_type_ids=0
    x_emb = (tok + pos + typ).astype(jnp.float32)                      # (B, S, H)

    # HF BERT additive mask bias, computed once, reused by every layer in-kernel.
    attn_bias = ((1.0 - attention_mask.astype(jnp.float32))
                 * (-10000.0))[:, None, :]                             # (B, 1, S)

    pooled = _fused_call(x_emb, attn_bias, packed)[:, 0, :]            # (B, H)

    # dropout(0.3) is identity at inference; final Linear(H,1) done here so the
    # kernel output stays lane-dense (perf review).
    return pooled @ packed["fc_w_t"] + packed["fc_b"]                  # (B, 1)


if __name__ == "__main__":
    key = jax.random.PRNGKey(0)
    pkey, ikey = jax.random.split(key)
    params = init_params(pkey)
    packed = pack_params(params)

    B, S = 2, 8
    input_ids = jax.random.randint(ikey, (B, S), 0, VOCAB, dtype=jnp.int32)
    attention_mask = jnp.array([[1, 1, 1, 1, 1, 1, 1, 1],
                                [1, 1, 1, 1, 1, 1, 0, 0]], dtype=jnp.int32)

    out = jax.jit(anime_rating_forward)(packed, input_ids, attention_mask)
    out = jax.block_until_ready(out)
    assert out.shape == (B, 1) and out.dtype == jnp.float32
    assert bool(jnp.all(jnp.isfinite(out)))
    print("KERNEL_OK")
</pallas_src>

<mosaic_0001>
module attributes {stable_mosaic.version = 11 : i64} {
  func.func @fused_forward_kernel(%arg0: i32, %arg1: i32, %arg2: memref<1x8x32xf32, #tpu.memory_space<vmem>>, %arg3: memref<1x1x8xf32, #tpu.memory_space<vmem>>, %arg4: memref<1x32xf32, #tpu.memory_space<vmem>>, %arg5: memref<1x32xf32, #tpu.memory_space<vmem>>, %arg6: memref<1x32x96xbf16, #tpu.memory_space<vmem>>, %arg7: memref<1x1x96xf32, #tpu.memory_space<vmem>>, %arg8: memref<1x32x32xbf16, #tpu.memory_space<vmem>>, %arg9: memref<1x1x32xf32, #tpu.memory_space<vmem>>, %arg10: memref<1x1x32xf32, #tpu.memory_space<vmem>>, %arg11: memref<1x1x32xf32, #tpu.memory_space<vmem>>, %arg12: memref<1x32x64xbf16, #tpu.memory_space<vmem>>, %arg13: memref<1x1x64xf32, #tpu.memory_space<vmem>>, %arg14: memref<1x64x32xbf16, #tpu.memory_space<vmem>>, %arg15: memref<1x1x32xf32, #tpu.memory_space<vmem>>, %arg16: memref<1x1x32xf32, #tpu.memory_space<vmem>>, %arg17: memref<1x1x32xf32, #tpu.memory_space<vmem>>, %arg18: memref<32x32xbf16, #tpu.memory_space<vmem>>, %arg19: memref<1x32xf32, #tpu.memory_space<vmem>>, %arg20: memref<1x1x32xf32, #tpu.memory_space<vmem>>, %arg21: memref<8x32xf32, #tpu.memory_space<vmem>>) attributes {dimension_semantics = [#tpu.dimension_semantics<parallel>, #tpu.dimension_semantics<arbitrary>], iteration_bounds = array<i64: 2, 2>, scalar_prefetch = 0 : i64, scratch_operands = 1 : i64, tpu.core_type = #tpu.core_type<tc>, window_params = [{transform_indices = @transform_0, window_bounds = array<i64: 1, 8, 32>}, {transform_indices = @transform_1, window_bounds = array<i64: 1, 1, 8>}, {pipeline_mode = #tpu.pipeline_mode<synchronous>, transform_indices = @transform_2, window_bounds = array<i64: 1, 32>}, {pipeline_mode = #tpu.pipeline_mode<synchronous>, transform_indices = @transform_3, window_bounds = array<i64: 1, 32>}, {transform_indices = @transform_4, window_bounds = array<i64: 1, 32, 96>}, {transform_indices = @transform_5, window_bounds = array<i64: 1, 1, 96>}, {transform_indices = @transform_6, window_bounds = array<i64: 1, 32, 32>}, {transform_indices = @transform_7, window_bounds = array<i64: 1, 1, 32>}, {transform_indices = @transform_8, window_bounds = array<i64: 1, 1, 32>}, {transform_indices = @transform_9, window_bounds = array<i64: 1, 1, 32>}, {transform_indices = @transform_10, window_bounds = array<i64: 1, 32, 64>}, {transform_indices = @transform_11, window_bounds = array<i64: 1, 1, 64>}, {transform_indices = @transform_12, window_bounds = array<i64: 1, 64, 32>}, {transform_indices = @transform_13, window_bounds = array<i64: 1, 1, 32>}, {transform_indices = @transform_14, window_bounds = array<i64: 1, 1, 32>}, {transform_indices = @transform_15, window_bounds = array<i64: 1, 1, 32>}, {pipeline_mode = #tpu.pipeline_mode<synchronous>, transform_indices = @transform_16, window_bounds = array<i64: 32, 32>}, {pipeline_mode = #tpu.pipeline_mode<synchronous>, transform_indices = @transform_17, window_bounds = array<i64: 1, 32>}, {transform_indices = @transform_18, window_bounds = array<i64: 1, 1, 32>}]} {
    %c0_i32 = arith.constant 0 : i32
    %0 = arith.cmpi eq, %arg1, %c0_i32 : i32
    %1 = arith.extui %0 : i1 to i32
    %c0_i32_0 = arith.constant 0 : i32
    %2 = arith.cmpi ne, %1, %c0_i32_0 : i32
    scf.if %2 {
      %c0_71 = arith.constant 0 : index
      %c0_72 = arith.constant 0 : index
      %c0_73 = arith.constant 0 : index
      %158 = vector.load %arg2[%c0_71, %c0_72, %c0_73] : memref<1x8x32xf32, #tpu.memory_space<vmem>>, vector<1x8x32xf32>
      %159 = vector.shape_cast %158 : vector<1x8x32xf32> to vector<8x32xf32>
      %c0_74 = arith.constant 0 : index
      %c0_75 = arith.constant 0 : index
      %160 = vector.load %arg4[%c0_74, %c0_75] : memref<1x32xf32, #tpu.memory_space<vmem>>, vector<1x32xf32>
      %c0_76 = arith.constant 0 : index
      %c0_77 = arith.constant 0 : index
      %161 = vector.load %arg5[%c0_76, %c0_77] : memref<1x32xf32, #tpu.memory_space<vmem>>, vector<1x32xf32>
      %cst_78 = arith.constant dense<0.000000e+00> : vector<8xf32>
      %162 = vector.multi_reduction <add>, %159, %cst_78 [1] : vector<8x32xf32> to vector<8xf32>
      %163 = vector.shape_cast %162 : vector<8xf32> to vector<8x1xf32>
      %cst_79 = arith.constant 3.200000e+01 : f32
      %164 = vector.broadcast %cst_79 : f32 to vector<8x1xf32>
      %165 = arith.divf %163, %164 : vector<8x1xf32>
      %166 = vector.broadcast %165 : vector<8x1xf32> to vector<8x32xf32>
      %167 = arith.subf %159, %166 : vector<8x32xf32>
      %168 = arith.mulf %167, %167 : vector<8x32xf32>
      %cst_80 = arith.constant dense<0.000000e+00> : vector<8xf32>
      %169 = vector.multi_reduction <add>, %168, %cst_80 [1] : vector<8x32xf32> to vector<8xf32>
      %170 = vector.shape_cast %169 : vector<8xf32> to vector<8x1xf32>
      %cst_81 = arith.constant 3.200000e+01 : f32
      %171 = vector.broadcast %cst_81 : f32 to vector<8x1xf32>
      %172 = arith.divf %170, %171 : vector<8x1xf32>
      %173 = vector.broadcast %165 : vector<8x1xf32> to vector<8x32xf32>
      %174 = arith.subf %159, %173 : vector<8x32xf32>
      %cst_82 = arith.constant 9.99999996E-13 : f32
      %175 = vector.broadcast %cst_82 : f32 to vector<8x1xf32>
      %176 = arith.addf %172, %175 : vector<8x1xf32>
      %177 = math.rsqrt %176 : vector<8x1xf32>
      %178 = vector.broadcast %177 : vector<8x1xf32> to vector<8x32xf32>
      %179 = arith.mulf %174, %178 : vector<8x32xf32>
      %180 = vector.broadcast %160 : vector<1x32xf32> to vector<8x32xf32>
      %181 = arith.mulf %179, %180 : vector<8x32xf32>
      %182 = vector.broadcast %161 : vector<1x32xf32> to vector<8x32xf32>
      %183 = arith.addf %181, %182 : vector<8x32xf32>
      %c0_83 = arith.constant 0 : index
      %c0_84 = arith.constant 0 : index
      %184 = vector.load %arg21[%c0_83, %c0_84] : memref<8x32xf32, #tpu.memory_space<vmem>>, vector<8x32xf32>
      tpu.vector_store %arg21[%c0_83, %c0_84], %183 {strides = array<i32>} : memref<8x32xf32, #tpu.memory_space<vmem>>, vector<8x32xf32>,
    } else {
    }
    %c0 = arith.constant 0 : index
    %c0_1 = arith.constant 0 : index
    %3 = vector.load %arg21[%c0, %c0_1] : memref<8x32xf32, #tpu.memory_space<vmem>>, vector<8x32xf32>
    %4 = arith.truncf %3 : vector<8x32xf32> to vector<8x32xbf16>
    %c0_2 = arith.constant 0 : index
    %c0_3 = arith.constant 0 : index
    %c0_4 = arith.constant 0 : index
    %5 = vector.load %arg6[%c0_2, %c0_3, %c0_4] : memref<1x32x96xbf16, #tpu.memory_space<vmem>>, vector<1x32x96xbf16>
    %6 = vector.shape_cast %5 : vector<1x32x96xbf16> to vector<32x96xbf16>
    %cst = arith.constant dense<0.000000e+00> : vector<8x96xf32>
    %7 = tpu.matmul %4, %6, %cst {dimension_numbers = #tpu.dot_dimension_numbers<[1], [0], [0], [1], [0, 0, 1, 1], [], []>} : vector<8x32xbf16>, vector<32x96xbf16>, vector<8x96xf32> -> vector<8x96xf32>
    %c0_5 = arith.constant 0 : index
    %c0_6 = arith.constant 0 : index
    %c0_7 = arith.constant 0 : index
    %8 = vector.load %arg7[%c0_5, %c0_6, %c0_7] : memref<1x1x96xf32, #tpu.memory_space<vmem>>, vector<1x1x96xf32>
    %9 = vector.shape_cast %8 : vector<1x1x96xf32> to vector<1x96xf32>
    %10 = vector.broadcast %9 : vector<1x96xf32> to vector<8x96xf32>
    %11 = arith.addf %7, %10 : vector<8x96xf32>
    %c0_8 = arith.constant 0 : index
    %c0_9 = arith.constant 0 : index
    %c0_10 = arith.constant 0 : index
    %12 = vector.load %arg3[%c0_8, %c0_9, %c0_10] : memref<1x1x8xf32, #tpu.memory_space<vmem>>, vector<1x1x8xf32>
    %13 = vector.shape_cast %12 : vector<1x1x8xf32> to vector<1x8xf32>
    %14 = vector.shape_cast %13 : vector<1x8xf32> to vector<1x8xf32>
    %15 = vector.broadcast %14 : vector<1x8xf32> to vector<8x8xf32>
    %c0_11 = arith.constant 0 : index
    %c0_12 = arith.constant 0 : index
    %c0_13 = arith.constant 0 : index
    %16 = vector.load %arg8[%c0_11, %c0_12, %c0_13] : memref<1x32x32xbf16, #tpu.memory_space<vmem>>, vector<1x32x32xbf16>
    %17 = vector.shape_cast %16 : vector<1x32x32xbf16> to vector<32x32xbf16>
    %cst_14 = arith.constant 0.000000e+00 : f32
    %18 = vector.broadcast %cst_14 : f32 to vector<8x32xf32>
    %19 = vector.extract_strided_slice %11 {offsets = [0, 0], sizes = [8, 16], strides = [1, 1]} : vector<8x96xf32> to vector<8x16xf32>
    %20 = arith.truncf %19 : vector<8x16xf32> to vector<8x16xbf16>
    %21 = vector.extract_strided_slice %11 {offsets = [0, 32], sizes = [8, 16], strides = [1, 1]} : vector<8x96xf32> to vector<8x16xf32>
    %22 = arith.truncf %21 : vector<8x16xf32> to vector<8x16xbf16>
    %23 = vector.extract_strided_slice %11 {offsets = [0, 64], sizes = [8, 16], strides = [1, 1]} : vector<8x96xf32> to vector<8x16xf32>
    %24 = arith.truncf %23 : vector<8x16xf32> to vector<8x16xbf16>
    %cst_15 = arith.constant dense<0.000000e+00> : vector<8x8xf32>
    %25 = tpu.matmul %20, %22, %cst_15 {dimension_numbers = #tpu.dot_dimension_numbers<[1], [1], [0], [0], [0, 0, 1, 0], [], []>} : vector<8x16xbf16>, vector<8x16xbf16>, vector<8x8xf32> -> vector<8x8xf32>
    %26 = arith.addf %25, %15 : vector<8x8xf32>
    %cst_16 = arith.constant dense<0xFF800000> : vector<8xf32>
    %27 = vector.multi_reduction <maximumf>, %26, %cst_16 [1] : vector<8x8xf32> to vector<8xf32>
    %28 = vector.shape_cast %27 : vector<8xf32> to vector<8x1xf32>
    %29 = vector.broadcast %28 : vector<8x1xf32> to vector<8x8xf32>
    %30 = arith.subf %26, %29 : vector<8x8xf32>
    %31 = math.exp %30 : vector<8x8xf32>
    %cst_17 = arith.constant dense<0.000000e+00> : vector<8xf32>
    %32 = vector.multi_reduction <add>, %31, %cst_17 [1] : vector<8x8xf32> to vector<8xf32>
    %33 = vector.shape_cast %32 : vector<8xf32> to vector<8x1xf32>
    %34 = tpu.reciprocal %33 {approx = true} : vector<8x1xf32> -> vector<8x1xf32>
    %35 = vector.broadcast %34 : vector<8x1xf32> to vector<8x8xf32>
    %36 = arith.mulf %31, %35 : vector<8x8xf32>
    %37 = arith.truncf %36 : vector<8x8xf32> to vector<8x8xbf16>
    %cst_18 = arith.constant dense<0.000000e+00> : vector<8x16xf32>
    %38 = tpu.matmul %37, %24, %cst_18 {dimension_numbers = #tpu.dot_dimension_numbers<[1], [0], [0], [1], [0, 0, 1, 1], [], []>} : vector<8x8xbf16>, vector<8x16xbf16>, vector<8x16xf32> -> vector<8x16xf32>
    %39 = arith.truncf %38 : vector<8x16xf32> to vector<8x16xbf16>
    %40 = vector.extract_strided_slice %17 {offsets = [0, 0], sizes = [16, 32], strides = [1, 1]} : vector<32x32xbf16> to vector<16x32xbf16>
    %cst_19 = arith.constant dense<0.000000e+00> : vector<8x32xf32>
    %41 = tpu.matmul %39, %40, %cst_19 {dimension_numbers = #tpu.dot_dimension_numbers<[1], [0], [0], [1], [0, 0, 1, 1], [], []>} : vector<8x16xbf16>, vector<16x32xbf16>, vector<8x32xf32> -> vector<8x32xf32>
    %42 = arith.addf %18, %41 : vector<8x32xf32>
    %43 = vector.extract_strided_slice %11 {offsets = [0, 16], sizes = [8, 16], strides = [1, 1]} : vector<8x96xf32> to vector<8x16xf32>
    %44 = arith.truncf %43 : vector<8x16xf32> to vector<8x16xbf16>
    %45 = vector.extract_strided_slice %11 {offsets = [0, 48], sizes = [8, 16], strides = [1, 1]} : vector<8x96xf32> to vector<8x16xf32>
    %46 = arith.truncf %45 : vector<8x16xf32> to vector<8x16xbf16>
    %47 = vector.extract_strided_slice %11 {offsets = [0, 80], sizes = [8, 16], strides = [1, 1]} : vector<8x96xf32> to vector<8x16xf32>
    %48 = arith.truncf %47 : vector<8x16xf32> to vector<8x16xbf16>
    %cst_20 = arith.constant dense<0.000000e+00> : vector<8x8xf32>
    %49 = tpu.matmul %44, %46, %cst_20 {dimension_numbers = #tpu.dot_dimension_numbers<[1], [1], [0], [0], [0, 0, 1, 0], [], []>} : vector<8x16xbf16>, vector<8x16xbf16>, vector<8x8xf32> -> vector<8x8xf32>
    %50 = arith.addf %49, %15 : vector<8x8xf32>
    %cst_21 = arith.constant dense<0xFF800000> : vector<8xf32>
    %51 = vector.multi_reduction <maximumf>, %50, %cst_21 [1] : vector<8x8xf32> to vector<8xf32>
    %52 = vector.shape_cast %51 : vector<8xf32> to vector<8x1xf32>
    %53 = vector.broadcast %52 : vector<8x1xf32> to vector<8x8xf32>
    %54 = arith.subf %50, %53 : vector<8x8xf32>
    %55 = math.exp %54 : vector<8x8xf32>
    %cst_22 = arith.constant dense<0.000000e+00> : vector<8xf32>
    %56 = vector.multi_reduction <add>, %55, %cst_22 [1] : vector<8x8xf32> to vector<8xf32>
    %57 = vector.shape_cast %56 : vector<8xf32> to vector<8x1xf32>
    %58 = tpu.reciprocal %57 {approx = true} : vector<8x1xf32> -> vector<8x1xf32>
    %59 = vector.broadcast %58 : vector<8x1xf32> to vector<8x8xf32>
    %60 = arith.mulf %55, %59 : vector<8x8xf32>
    %61 = arith.truncf %60 : vector<8x8xf32> to vector<8x8xbf16>
    %cst_23 = arith.constant dense<0.000000e+00> : vector<8x16xf32>
    %62 = tpu.matmul %61, %48, %cst_23 {dimension_numbers = #tpu.dot_dimension_numbers<[1], [0], [0], [1], [0, 0, 1, 1], [], []>} : vector<8x8xbf16>, vector<8x16xbf16>, vector<8x16xf32> -> vector<8x16xf32>
    %63 = arith.truncf %62 : vector<8x16xf32> to vector<8x16xbf16>
    %64 = vector.extract_strided_slice %17 {offsets = [16, 0], sizes = [16, 32], strides = [1, 1]} : vector<32x32xbf16> to vector<16x32xbf16>
    %cst_24 = arith.constant dense<0.000000e+00> : vector<8x32xf32>
    %65 = tpu.matmul %63, %64, %cst_24 {dimension_numbers = #tpu.dot_dimension_numbers<[1], [0], [0], [1], [0, 0, 1, 1], [], []>} : vector<8x16xbf16>, vector<16x32xbf16>, vector<8x32xf32> -> vector<8x32xf32>
    %66 = arith.addf %42, %65 : vector<8x32xf32>
    %67 = arith.addf %3, %66 : vector<8x32xf32>
    %c0_25 = arith.constant 0 : index
    %c0_26 = arith.constant 0 : index
    %c0_27 = arith.constant 0 : index
    %68 = vector.load %arg9[%c0_25, %c0_26, %c0_27] : memref<1x1x32xf32, #tpu.memory_space<vmem>>, vector<1x1x32xf32>
    %69 = vector.shape_cast %68 : vector<1x1x32xf32> to vector<1x32xf32>
    %70 = vector.broadcast %69 : vector<1x32xf32> to vector<8x32xf32>
    %71 = arith.addf %67, %70 : vector<8x32xf32>
    %c0_28 = arith.constant 0 : index
    %c0_29 = arith.constant 0 : index
    %c0_30 = arith.constant 0 : index
    %72 = vector.load %arg10[%c0_28, %c0_29, %c0_30] : memref<1x1x32xf32, #tpu.memory_space<vmem>>, vector<1x1x32xf32>
    %73 = vector.shape_cast %72 : vector<1x1x32xf32> to vector<1x32xf32>
    %c0_31 = arith.constant 0 : index
    %c0_32 = arith.constant 0 : index
    %c0_33 = arith.constant 0 : index
    %74 = vector.load %arg11[%c0_31, %c0_32, %c0_33] : memref<1x1x32xf32, #tpu.memory_space<vmem>>, vector<1x1x32xf32>
    %75 = vector.shape_cast %74 : vector<1x1x32xf32> to vector<1x32xf32>
    %cst_34 = arith.constant dense<0.000000e+00> : vector<8xf32>
    %76 = vector.multi_reduction <add>, %71, %cst_34 [1] : vector<8x32xf32> to vector<8xf32>
    %77 = vector.shape_cast %76 : vector<8xf32> to vector<8x1xf32>
    %cst_35 = arith.constant 3.200000e+01 : f32
    %78 = vector.broadcast %cst_35 : f32 to vector<8x1xf32>
    %79 = arith.divf %77, %78 : vector<8x1xf32>
    %80 = vector.broadcast %79 : vector<8x1xf32> to vector<8x32xf32>
    %81 = arith.subf %71, %80 : vector<8x32xf32>
    %82 = arith.mulf %81, %81 : vector<8x32xf32>
    %cst_36 = arith.constant dense<0.000000e+00> : vector<8xf32>
    %83 = vector.multi_reduction <add>, %82, %cst_36 [1] : vector<8x32xf32> to vector<8xf32>
    %84 = vector.shape_cast %83 : vector<8xf32> to vector<8x1xf32>
    %cst_37 = arith.constant 3.200000e+01 : f32
    %85 = vector.broadcast %cst_37 : f32 to vector<8x1xf32>
    %86 = arith.divf %84, %85 : vector<8x1xf32>
    %87 = vector.broadcast %79 : vector<8x1xf32> to vector<8x32xf32>
    %88 = arith.subf %71, %87 : vector<8x32xf32>
    %cst_38 = arith.constant 9.99999996E-13 : f32
    %89 = vector.broadcast %cst_38 : f32 to vector<8x1xf32>
    %90 = arith.addf %86, %89 : vector<8x1xf32>
    %91 = math.rsqrt %90 : vector<8x1xf32>
    %92 = vector.broadcast %91 : vector<8x1xf32> to vector<8x32xf32>
    %93 = arith.mulf %88, %92 : vector<8x32xf32>
    %94 = vector.broadcast %73 : vector<1x32xf32> to vector<8x32xf32>
    %95 = arith.mulf %93, %94 : vector<8x32xf32>
    %96 = vector.broadcast %75 : vector<1x32xf32> to vector<8x32xf32>
    %97 = arith.addf %95, %96 : vector<8x32xf32>
    %98 = arith.truncf %97 : vector<8x32xf32> to vector<8x32xbf16>
    %c0_39 = arith.constant 0 : index
    %c0_40 = arith.constant 0 : index
    %c0_41 = arith.constant 0 : index
    %99 = vector.load %arg12[%c0_39, %c0_40, %c0_41] : memref<1x32x64xbf16, #tpu.memory_space<vmem>>, vector<1x32x64xbf16>
    %100 = vector.shape_cast %99 : vector<1x32x64xbf16> to vector<32x64xbf16>
    %cst_42 = arith.constant dense<0.000000e+00> : vector<8x64xf32>
    %101 = tpu.matmul %98, %100, %cst_42 {dimension_numbers = #tpu.dot_dimension_numbers<[1], [0], [0], [1], [0, 0, 1, 1], [], []>} : vector<8x32xbf16>, vector<32x64xbf16>, vector<8x64xf32> -> vector<8x64xf32>
    %c0_43 = arith.constant 0 : index
    %c0_44 = arith.constant 0 : index
    %c0_45 = arith.constant 0 : index
    %102 = vector.load %arg13[%c0_43, %c0_44, %c0_45] : memref<1x1x64xf32, #tpu.memory_space<vmem>>, vector<1x1x64xf32>
    %103 = vector.shape_cast %102 : vector<1x1x64xf32> to vector<1x64xf32>
    %104 = vector.broadcast %103 : vector<1x64xf32> to vector<8x64xf32>
    %105 = arith.addf %101, %104 : vector<8x64xf32>
    %cst_46 = arith.constant 5.000000e-01 : f32
    %106 = vector.broadcast %cst_46 : f32 to vector<8x64xf32>
    %107 = arith.mulf %106, %105 : vector<8x64xf32>
    %cst_47 = arith.constant 4.471500e-02 : f32
    %108 = vector.broadcast %cst_47 : f32 to vector<8x64xf32>
    %109 = arith.mulf %108, %105 : vector<8x64xf32>
    %110 = arith.mulf %109, %105 : vector<8x64xf32>
    %111 = arith.mulf %110, %105 : vector<8x64xf32>
    %112 = arith.addf %105, %111 : vector<8x64xf32>
    %cst_48 = arith.constant 0.797884583 : f32
    %113 = vector.broadcast %cst_48 : f32 to vector<8x64xf32>
    %114 = arith.mulf %113, %112 : vector<8x64xf32>
    %115 = math.tanh %114 : vector<8x64xf32>
    %cst_49 = arith.constant 1.000000e+00 : f32
    %116 = vector.broadcast %cst_49 : f32 to vector<8x64xf32>
    %117 = arith.addf %116, %115 : vector<8x64xf32>
    %118 = arith.mulf %107, %117 : vector<8x64xf32>
    %119 = arith.truncf %118 : vector<8x64xf32> to vector<8x64xbf16>
    %c0_50 = arith.constant 0 : index
    %c0_51 = arith.constant 0 : index
    %c0_52 = arith.constant 0 : index
    %120 = vector.load %arg14[%c0_50, %c0_51, %c0_52] : memref<1x64x32xbf16, #tpu.memory_space<vmem>>, vector<1x64x32xbf16>
    %121 = vector.shape_cast %120 : vector<1x64x32xbf16> to vector<64x32xbf16>
    %cst_53 = arith.constant dense<0.000000e+00> : vector<8x32xf32>
    %122 = tpu.matmul %119, %121, %cst_53 {dimension_numbers = #tpu.dot_dimension_numbers<[1], [0], [0], [1], [0, 0, 1, 1], [], []>} : vector<8x64xbf16>, vector<64x32xbf16>, vector<8x32xf32> -> vector<8x32xf32>
    %c0_54 = arith.constant 0 : index
    %c0_55 = arith.constant 0 : index
    %c0_56 = arith.constant 0 : index
    %123 = vector.load %arg15[%c0_54, %c0_55, %c0_56] : memref<1x1x32xf32, #tpu.memory_space<vmem>>, vector<1x1x32xf32>
    %124 = vector.shape_cast %123 : vector<1x1x32xf32> to vector<1x32xf32>
    %125 = vector.broadcast %124 : vector<1x32xf32> to vector<8x32xf32>
    %126 = arith.addf %122, %125 : vector<8x32xf32>
    %127 = arith.addf %97, %126 : vector<8x32xf32>
    %c0_57 = arith.constant 0 : index
    %c0_58 = arith.constant 0 : index
    %c0_59 = arith.constant 0 : index
    %128 = vector.load %arg16[%c0_57, %c0_58, %c0_59] : memref<1x1x32xf32, #tpu.memory_space<vmem>>, vector<1x1x32xf32>
    %129 = vector.shape_cast %128 : vector<1x1x32xf32> to vector<1x32xf32>
    %c0_60 = arith.constant 0 : index
    %c0_61 = arith.constant 0 : index
    %c0_62 = arith.constant 0 : index
    %130 = vector.load %arg17[%c0_60, %c0_61, %c0_62] : memref<1x1x32xf32, #tpu.memory_space<vmem>>, vector<1x1x32xf32>
    %131 = vector.shape_cast %130 : vector<1x1x32xf32> to vector<1x32xf32>
    %cst_63 = arith.constant dense<0.000000e+00> : vector<8xf32>
    %132 = vector.multi_reduction <add>, %127, %cst_63 [1] : vector<8x32xf32> to vector<8xf32>
    %133 = vector.shape_cast %132 : vector<8xf32> to vector<8x1xf32>
    %cst_64 = arith.constant 3.200000e+01 : f32
    %134 = vector.broadcast %cst_64 : f32 to vector<8x1xf32>
    %135 = arith.divf %133, %134 : vector<8x1xf32>
    %136 = vector.broadcast %135 : vector<8x1xf32> to vector<8x32xf32>
    %137 = arith.subf %127, %136 : vector<8x32xf32>
    %138 = arith.mulf %137, %137 : vector<8x32xf32>
    %cst_65 = arith.constant dense<0.000000e+00> : vector<8xf32>
    %139 = vector.multi_reduction <add>, %138, %cst_65 [1] : vector<8x32xf32> to vector<8xf32>
    %140 = vector.shape_cast %139 : vector<8xf32> to vector<8x1xf32>
    %cst_66 = arith.constant 3.200000e+01 : f32
    %141 = vector.broadcast %cst_66 : f32 to vector<8x1xf32>
    %142 = arith.divf %140, %141 : vector<8x1xf32>
    %143 = vector.broadcast %135 : vector<8x1xf32> to vector<8x32xf32>
    %144 = arith.subf %127, %143 : vector<8x32xf32>
    %cst_67 = arith.constant 9.99999996E-13 : f32
    %145 = vector.broadcast %cst_67 : f32 to vector<8x1xf32>
    %146 = arith.addf %142, %145 : vector<8x1xf32>
    %147 = math.rsqrt %146 : vector<8x1xf32>
    %148 = vector.broadcast %147 : vector<8x1xf32> to vector<8x32xf32>
    %149 = arith.mulf %144, %148 : vector<8x32xf32>
    %150 = vector.broadcast %129 : vector<1x32xf32> to vector<8x32xf32>
    %151 = arith.mulf %149, %150 : vector<8x32xf32>
    %152 = vector.broadcast %131 : vector<1x32xf32> to vector<8x32xf32>
    %153 = arith.addf %151, %152 : vector<8x32xf32>
    %c0_68 = arith.constant 0 : index
    %c0_69 = arith.constant 0 : index
    %154 = vector.load %arg21[%c0_68, %c0_69] : memref<8x32xf32, #tpu.memory_space<vmem>>, vector<8x32xf32>
    tpu.vector_store %arg21[%c0_68, %c0_69], %153 {strides = array<i32>} : memref<8x32xf32, #tpu.memory_space<vmem>>, vector<8x32xf32>,
    %c1_i32 = arith.constant 1 : i32
    %155 = arith.cmpi eq, %arg1, %c1_i32 : i32
    %156 = arith.extui %155 : i1 to i32
    %c0_i32_70 = arith.constant 0 : i32
    %157 = arith.cmpi ne, %156, %c0_i32_70 : i32
    scf.if %157 {
      %158 = vector.extract_strided_slice %153 {offsets = [0, 0], sizes = [1, 32], strides = [1, 1]} : vector<8x32xf32> to vector<1x32xf32>
      %159 = arith.truncf %158 : vector<1x32xf32> to vector<1x32xbf16>
      %c0_71 = arith.constant 0 : index
      %c0_72 = arith.constant 0 : index
      %160 = vector.load %arg18[%c0_71, %c0_72] : memref<32x32xbf16, #tpu.memory_space<vmem>>, vector<32x32xbf16>
      %cst_73 = arith.constant dense<0.000000e+00> : vector<1x32xf32>
      %161 = tpu.matmul %159, %160, %cst_73 {dimension_numbers = #tpu.dot_dimension_numbers<[1], [0], [0], [1], [0, 0, 1, 1], [], []>} : vector<1x32xbf16>, vector<32x32xbf16>, vector<1x32xf32> -> vector<1x32xf32>
      %c0_74 = arith.constant 0 : index
      %c0_75 = arith.constant 0 : index
      %162 = vector.load %arg19[%c0_74, %c0_75] : memref<1x32xf32, #tpu.memory_space<vmem>>, vector<1x32xf32>
      %163 = arith.addf %161, %162 : vector<1x32xf32>
      %164 = math.tanh %163 : vector<1x32xf32>
      %c0_76 = arith.constant 0 : index
      %c0_77 = arith.constant 0 : index
      %c0_78 = arith.constant 0 : index
      %165 = vector.load %arg20[%c0_76, %c0_77, %c0_78] : memref<1x1x32xf32, #tpu.memory_space<vmem>>, vector<1x1x32xf32>
      %166 = vector.shape_cast %165 : vector<1x1x32xf32> to vector<1x32xf32>
      %167 = vector.shape_cast %164 : vector<1x32xf32> to vector<1x1x32xf32>
      tpu.vector_store %arg20[%c0_76, %c0_77, %c0_78], %167 {strides = array<i32>} : memref<1x1x32xf32, #tpu.memory_space<vmem>>, vector<1x1x32xf32>,
    } else {
    }
    return
  }
  func.func @transform_0(%arg0: i32, %arg1: i32) -> (i32, i32, i32) {
    %c0_i32 = arith.constant 0 : i32
    %c0_i32_0 = arith.constant 0 : i32
    %c0_i32_1 = arith.constant 0 : i32
    return %arg0, %c0_i32, %c0_i32_0 : i32, i32, i32
  }
  func.func @transform_1(%arg0: i32, %arg1: i32) -> (i32, i32, i32) {
    %c0_i32 = arith.constant 0 : i32
    %c0_i32_0 = arith.constant 0 : i32
    %c0_i32_1 = arith.constant 0 : i32
    return %arg0, %c0_i32, %c0_i32_0 : i32, i32, i32
  }
  func.func @transform_2(%arg0: i32, %arg1: i32) -> (i32, i32) {
    %c0_i32 = arith.constant 0 : i32
    %c0_i32_0 = arith.constant 0 : i32
    %c0_i32_1 = arith.constant 0 : i32
    return %c0_i32, %c0_i32_0 : i32, i32
  }
  func.func @transform_3(%arg0: i32, %arg1: i32) -> (i32, i32) {
    %c0_i32 = arith.constant 0 : i32
    %c0_i32_0 = arith.constant 0 : i32
    %c0_i32_1 = arith.constant 0 : i32
    return %c0_i32, %c0_i32_0 : i32, i32
  }
  func.func @transform_4(%arg0: i32, %arg1: i32) -> (i32, i32, i32) {
    %c0_i32 = arith.constant 0 : i32
    %c0_i32_0 = arith.constant 0 : i32
    %c0_i32_1 = arith.constant 0 : i32
    return %arg1, %c0_i32, %c0_i32_0 : i32, i32, i32
  }
  func.func @transform_5(%arg0: i32, %arg1: i32) -> (i32, i32, i32) {
    %c0_i32 = arith.constant 0 : i32
    %c0_i32_0 = arith.constant 0 : i32
    %c0_i32_1 = arith.constant 0 : i32
    return %arg1, %c0_i32, %c0_i32_0 : i32, i32, i32
  }
  func.func @transform_6(%arg0: i32, %arg1: i32) -> (i32, i32, i32) {
    %c0_i32 = arith.constant 0 : i32
    %c0_i32_0 = arith.constant 0 : i32
    %c0_i32_1 = arith.constant 0 : i32
    return %arg1, %c0_i32, %c0_i32_0 : i32, i32, i32
  }
  func.func @transform_7(%arg0: i32, %arg1: i32) -> (i32, i32, i32) {
    %c0_i32 = arith.constant 0 : i32
    %c0_i32_0 = arith.constant 0 : i32
    %c0_i32_1 = arith.constant 0 : i32
    return %arg1, %c0_i32, %c0_i32_0 : i32, i32, i32
  }
  func.func @transform_8(%arg0: i32, %arg1: i32) -> (i32, i32, i32) {
    %c0_i32 = arith.constant 0 : i32
    %c0_i32_0 = arith.constant 0 : i32
    %c0_i32_1 = arith.constant 0 : i32
    return %arg1, %c0_i32, %c0_i32_0 : i32, i32, i32
  }
  func.func @transform_9(%arg0: i32, %arg1: i32) -> (i32, i32, i32) {
    %c0_i32 = arith.constant 0 : i32
    %c0_i32_0 = arith.constant 0 : i32
    %c0_i32_1 = arith.constant 0 : i32
    return %arg1, %c0_i32, %c0_i32_0 : i32, i32, i32
  }
  func.func @transform_10(%arg0: i32, %arg1: i32) -> (i32, i32, i32) {
    %c0_i32 = arith.constant 0 : i32
    %c0_i32_0 = arith.constant 0 : i32
    %c0_i32_1 = arith.constant 0 : i32
    return %arg1, %c0_i32, %c0_i32_0 : i32, i32, i32
  }
  func.func @transform_11(%arg0: i32, %arg1: i32) -> (i32, i32, i32) {
    %c0_i32 = arith.constant 0 : i32
    %c0_i32_0 = arith.constant 0 : i32
    %c0_i32_1 = arith.constant 0 : i32
    return %arg1, %c0_i32, %c0_i32_0 : i32, i32, i32
  }
  func.func @transform_12(%arg0: i32, %arg1: i32) -> (i32, i32, i32) {
    %c0_i32 = arith.constant 0 : i32
    %c0_i32_0 = arith.constant 0 : i32
    %c0_i32_1 = arith.constant 0 : i32
    return %arg1, %c0_i32, %c0_i32_0 : i32, i32, i32
  }
  func.func @transform_13(%arg0: i32, %arg1: i32) -> (i32, i32, i32) {
    %c0_i32 = arith.constant 0 : i32
    %c0_i32_0 = arith.constant 0 : i32
    %c0_i32_1 = arith.constant 0 : i32
    return %arg1, %c0_i32, %c0_i32_0 : i32, i32, i32
  }
  func.func @transform_14(%arg0: i32, %arg1: i32) -> (i32, i32, i32) {
    %c0_i32 = arith.constant 0 : i32
    %c0_i32_0 = arith.constant 0 : i32
    %c0_i32_1 = arith.constant 0 : i32
    return %arg1, %c0_i32, %c0_i32_0 : i32, i32, i32
  }
  func.func @transform_15(%arg0: i32, %arg1: i32) -> (i32, i32, i32) {
    %c0_i32 = arith.constant 0 : i32
    %c0_i32_0 = arith.constant 0 : i32
    %c0_i32_1 = arith.constant 0 : i32
    return %arg1, %c0_i32, %c0_i32_0 : i32, i32, i32
  }
  func.func @transform_16(%arg0: i32, %arg1: i32) -> (i32, i32) {
    %c0_i32 = arith.constant 0 : i32
    %c0_i32_0 = arith.constant 0 : i32
    %c0_i32_1 = arith.constant 0 : i32
    return %c0_i32, %c0_i32_0 : i32, i32
  }
  func.func @transform_17(%arg0: i32, %arg1: i32) -> (i32, i32) {
    %c0_i32 = arith.constant 0 : i32
    %c0_i32_0 = arith.constant 0 : i32
    %c0_i32_1 = arith.constant 0 : i32
    return %c0_i32, %c0_i32_0 : i32, i32
  }
  func.func @transform_18(%arg0: i32, %arg1: i32) -> (i32, i32, i32) {
    %c0_i32 = arith.constant 0 : i32
    %c0_i32_0 = arith.constant 0 : i32
    %c0_i32_1 = arith.constant 0 : i32
    return %arg0, %c0_i32, %c0_i32_0 : i32, i32, i32
  }
}

</mosaic_0001>

<bundles_post_ra>
// kernel: anime_rating_forward.1
= control target key start
LH: loop header
LB: loop body
LE: loop exit
PB: predicated region body
PF: predicated region fallthrough
CT: control target
= control target key end

     0   :  { %s2089_s27 = smov 0   ;;  %s2091_s28 = smov 0   ;;  %s2345_s0 = inlined_call_operand.vmem [shape: f32[2,8,32], index: 0, kind: input, shape index: {}]   ;;  %s2346_s1 = inlined_call_operand.vmem [shape: f32[2,1,8], index: 1, kind: input, shape index: {}]   ;;  %s2347_s2 = inlined_call_operand.vmem [shape: f32[1,32], index: 2, kind: input, shape index: {}]   ;;  %s2348_s3 = inlined_call_operand.vmem [shape: f32[1,32], index: 3, kind: input, shape index: {}]   ;;  %s2349_s4 = inlined_call_operand.vmem [shape: bf16[2,32,96], index: 4, kind: input, shape index: {}]   ;;  %s2350_s5 = inlined_call_operand.vmem [shape: f32[2,1,96], index: 5, kind: input, shape index: {}]   ;;  %s2351_s6 = inlined_call_operand.vmem [shape: bf16[2,32,32], index: 6, kind: input, shape index: {}]   ;;  %s2352_s7 = inlined_call_operand.vmem [shape: f32[2,1,32], index: 7, kind: input, shape index: {}]   ;;  %s2353_s8 = inlined_call_operand.vmem [shape: f32[2,1,32], index: 8, kind: input, shape index: {}]   ;;  %s2354_s9 = inlined_call_operand.vmem [shape: f32[2,1,32], index: 9, kind: input, shape index: {}]   ;;  %s2355_s10 = inlined_call_operand.vmem [shape: bf16[2,32,64], index: 10, kind: input, shape index: {}]   ;;  %s2356_s11 = inlined_call_operand.vmem [shape: f32[2,1,64], index: 11, kind: input, shape index: {}]   ;;  %s2357_s12 = inlined_call_operand.vmem [shape: bf16[2,64,32], index: 12, kind: input, shape index: {}]   ;;  %s2358_s13 = inlined_call_operand.vmem [shape: f32[2,1,32], index: 13, kind: input, shape index: {}]   ;;  %s2359_s14 = inlined_call_operand.vmem [shape: f32[2,1,32], index: 14, kind: input, shape index: {}]   ;;  %s2360_s15 = inlined_call_operand.vmem [shape: f32[2,1,32], index: 15, kind: input, shape index: {}]   ;;  %s2361_s16 = inlined_call_operand.vmem [shape: bf16[32,32], index: 16, kind: input, shape index: {}]   ;;  %s2362_s17 = inlined_call_operand.vmem [shape: f32[1,32], index: 17, kind: input, shape index: {}]   ;;  %s2363_s18 = inlined_call_operand.vmem [shape: f32[2,1,32], index: 18, kind: output, shape index: {}]  }
   0x1   :  { %2369 = sst [smem:[#allocation9_spill]] %s2345_s0  ;;  %s2093_s29 = smov 0  }
   0x2   :  { %2370 = sst [smem:[#allocation10_spill]] %s2346_s1  ;;  %s2095_s30 = smov 0  }
   0x3   :  { %2371 = sst [smem:[#allocation11_spill]] %s2347_s2  ;;  %s2097_s0 = smov 0  }
   0x4   :  { %2372 = sst [smem:[#allocation12_spill]] %s2348_s3 }
   0x5   :  { %2373 = sst [smem:[#allocation13_spill]] %s2349_s4 }
   0x6   :  { %2374 = sst [smem:[#allocation14_spill]] %s2351_s6 }
   0x7   :  { %2375 = sst [smem:[#allocation15_spill]] %s2354_s9 }
   0x8   :  { %2376 = sst [smem:[#allocation16_spill]] %s2355_s10 }
   0x9   :  { %2377 = sst [smem:[#allocation17_spill]] %s2356_s11 }
   0xa   :  { %2378 = sst [smem:[#allocation18_spill]] %s2360_s15 }
   0xb   :  { %2379 = sst [smem:[#allocation19_spill]] %s2361_s16 }
   0xc   :  { %2380 = sst [smem:[#allocation20_spill]] %s2362_s17 }
   0xd   :  { %2381 = sst [smem:[#allocation21_spill]] %s2363_s18 }
   0xe LB: > { %2382 = sst [smem:[#allocation3_spill]] %s1967_s27  ;;  %s37_s19 = sadd.s32 1, %s1975_s29  ;;  %s1983_s0 = sphi %s2097_s0, %s28_s0   ;;  %s1979_s30 = sphi %s2095_s30, %s2418_s30   ;;  %s1975_s29 = sphi %s2093_s29, %s2417_s29   ;;  %s1971_s28 = sphi %s2091_s28, %s2416_s28   ;;  %s1967_s27 = sphi %s2089_s27, %s2415_s27  }
   0xf   : > { %2383 = sst [smem:[#allocation4_spill]] %s1975_s29  ;;  %s40_s1 = sadd.s32 1, %s1979_s30 }
  0x10   : > { %2384 = sst [smem:[#allocation5_spill]] %s1979_s30  ;;  %p38_p0 = scmp.ge.s32.totalorder %s37_s19, 2 }
  0x11   : > { %2385 = sst [smem:[#allocation6_spill]] %s1983_s0  ;;  %p1717_p1 = scmp.ge.s32.totalorder %s1983_s0, 1 }
  0x12   : > { %p635_p2 = scmp.lt.s32.totalorder %s1983_s0, 5  ;;  %s2420_s19 = smov (%p38_p0, %s37_s19), 0 }
  0x13   : > { %2386 = sst [smem:[#allocation7_spill]] %s2420_s19  ;;  %s2422_s1 = smov (!%p38_p0, %s40_s1), %s1979_s30 }
  0x14   : > { %p636_p3 = pnand %p1717_p1, %p635_p2  ;;  %p42_p4 = scmp.ge.s32.totalorder %s2422_s1, 2 }
  0x15   : > { %p733_p5 = scmp.lt.s32.totalorder (!%p636_p3), %s1971_s28, 1  ;;  %p740_p6 = scmp.lt.s32.totalorder (!%p636_p3), %s1967_s27, 1 }
  0x16   : > { %s2424_s1 = smov (%p42_p4, %s2422_s1), 0  ;;  %639 = sbr.rel (%p636_p3) target bundleno = 2858 (0xb2a), region = 92 }
  0x17   : > { %2387 = sst [smem:[#allocation8_spill]] %s2424_s1 }
  0x18   : > { %s2389_s1 = sld [smem:[#allocation9_spill]] (!%p636_p3) }
  0x19   : > { %s2390_s4 = sld [smem:[#allocation13_spill]] (!%p636_p3) }
  0x1a   : > { %s2391_s6 = sld [smem:[#allocation14_spill]] (!%p636_p3) }
  0x1b   : > { %s2426_s28 = smov (!%p733_p5, %s1971_s28), 1  ;;  %s2393_s10 = sld [smem:[#allocation16_spill]] }
  0x1c   : > { %s2125_s20 = scalar_select %p740_p6, %s1967_s27, 1 }
  0x1d   : > { %s1718_s21 = sshll.u32 %s2426_s28, 3  ;;  %s2395_s24 = sld [smem:[#allocation18_spill]] }
  0x1e   : > { %s736_s19 = scalar_lea.vmem %s2389_s1, %s1718_s21  ;;  %s1764_s30 = sshll.u32 %s2125_s20, 4 }
  0x1f   : > { %s2139_s17 = scalar_lea.vmem %s2390_s4, %s1764_s30  ;;  %s777_s25 = scalar_lea.vmem %s2358_s13, %s2125_s20 }
  0x20   : > { %s2148_s22 = scalar_lea.vmem %s2391_s6, %s1764_s30  ;;  %s1767_s6 = sshll.u32 %s2125_s20, 5 }
  0x21   : > { %s2165_s16 = scalar_lea.vmem %s2393_s10, %s1764_s30  ;;  %s2179_s26 = scalar_lea.vmem %s2357_s12, %s1767_s6 }
  0x22   : > { %s780_s4 = scalar_lea.vmem %s2359_s14, %s2125_s20  ;;  %s2396_s27 = sld [smem:[#allocation21_spill]] }
  0x23   : > { %s783_s10 = scalar_lea.vmem %s2395_s24, %s2125_s20  ;;  %s2397_s9 = sld [smem:[#allocation3_spill]] }
  0x28   : > { %s786_s11 = scalar_lea.vmem %s2396_s27, %s2426_s28 }
  0x29   : > { %p1727_p7 = scmp.ne.s32.totalorder %s2397_s9, 0 }
  0x2a   : > { %s2398_s27 = sld [smem:[#allocation11_spill]] (!%p1727_p7) }
  0x2b   : > { %791 = sbr.rel (%p1727_p7) target bundleno = 358 (0x166), region = 96  ;;  %s2399_s2 = sld [smem:[#allocation12_spill]] (!%p1727_p7) }
  0x30   : > { %v792_v0 = vld [vmem:[%s736_s19] sm:$0xff]  ;;  %vm795_vm0 = vcmask 261120  }
  0x31   : > { %v796_v1 = vsel %vm795_vm0, %v792_v0, 0.0  ;;  %v1728_v11 = vld [vmem:[%s2398_s27] ss:$0 sm:$0xff] }
  0x32   : > { %797 = vadd.xlane.f32.xlu0 %v796_v1  ;;  %v1729_v13 = vld [vmem:[%s2399_s2] ss:$0 sm:$0xff] }
  0xbb   : > { %v798_v2 = vpop.xlane.xlu0 %797 }
  0xbc   : > { %v800_v3 = vmul.f32 0.03125, %v798_v2 }
  0xbe   : > { %v801_v4 = vsub.f32 %v792_v0, %v800_v3 }
  0xc0   : > { %v802_v5 = vmul.f32 %v801_v4, %v801_v4 }
  0xc2   : > { %v803_v6 = vsel %vm795_vm0, %v802_v5, 0.0 }
  0xc3   : > { %804 = vadd.xlane.f32.xlu0 %v803_v6 }
 0x14c   : > { %v805_v7 = vpop.xlane.xlu0 %804 }
 0x14d   : > { %v806_v8 = vmul.f32 0.03125, %v805_v7 }
 0x14f   : > { %v807_v9 = vadd.f32 1e-12, %v806_v8 }
 0x151   : > { %1915 = vrsqrt.f32 %v807_v9 }
 0x15e   : > { %v1916_v10 = vpop.eup %1915 }
 0x15f   : > { %v809_v12 = vmul.f32 %v1916_v10, %v801_v4 }
 0x161   : > { %v816_v14 = vmul.f32 %v1728_v11, %v809_v12 }
 0x163   : > { %v823_v15 = vadd.f32 %v1729_v13, %v816_v14 }
 0x165   : > { %824 = vst.msk [vmem:[#allocation2] sm:$0xff] %vm795_vm0, %v823_v15 }
 0x166 PF: > { %v1917_v16 = vld [vmem:[%s2139_s17 + $0x8] sm:$0xff]   ;;  %v1985_v17 = vmov 0.0   ;;  %v1918_v18 = vld [vmem:[%s2139_s17] sm:$0xff]   ;;  %vm1986_vm1 = vmmov 0   ;;  %vm850_vm2 = vcmask 261120   ;;  %s2400_s1 = scalar_lea.vmem %s2350_s5, %s2125_s20  ;;  %s1987_s21 = smov 112  }
 0x167   : > { %1794 = vmatprep.subr.bf16.mxu1 %v1985_v17  ;;  %1808 = vmatprep.subr.bf16.mxu0 %v1985_v17  ;;  %v1730_v21 = vld [vmem:[%s2400_s1] ss:$0 sm:$0xff]  ;;  %s1988_s29 = smov 96   ;;  %s1989_s0 = smov 80   ;;  %vm909_vm3 = vcmask 130048   ;;  %vm956_vm4 = vcmask 64512  }
 0x168   : > { %1795 = vmatpush3.bf16.msra.mxu1 %v1917_v16  ;;  %1798 = vmatprep.mubr.msk.bf16.mxu1 %vm1986_vm1, %v1985_v17  ;;  %s2401_s15 = sld [smem:[#allocation10_spill]]  ;;  %s1990_s6 = smov 64   ;;  %vm974_vm5 = vcmask 1043456   ;;  %v1919_v4 = vld [vmem:[%s2148_s22] sm:$0xff]   ;;  %v1920_v5 = vld [vmem:[%s2148_s22 + $0x8] sm:$0xff]   ;;  %vm1383_vm6 = vcmask 523264  }
 0x169   : > { %1796 = vmatprep.subr.bf16.mxu1 %v1985_v17  ;;  %1810 = vmatprep.mubr.msk.bf16.mxu0 %vm1986_vm1, %v1985_v17  ;;  %s1991_s9 = smov 48   ;;  %s2403_s19 = scalar_lea.vmem %s2352_s7, %s2125_s20 }
 0x16a   : > { %s2404_s17 = scalar_lea.vmem %s2353_s8, %s2125_s20  ;;  %s2407_s30 = sld [smem:[#allocation17_spill]] }
 0x16b   : > { %s2410_s27 = sld [smem:[#allocation3_spill]] }
 0x16c   : > { %v2209_v19 = vld [vmem:[#allocation2] sm:$0xff]  ;;  %1797 = vmatpush3.bf16.msra.mxu1 %v1918_v18 }
 0x16d   : > { %v826_v20 = vpack.c.bf16 %v2209_v19, %v2209_v19  ;;  %1802 = vmatprep.subr.bf16.mxu1 %v1985_v17 }
 0x16e   : > { %s2402_s18 = scalar_lea.vmem %s2401_s15, %s2426_s28 }
 0x16f   : > { %1799 = vmatmul.mubr.msk.bf16.vlgmr.msra.gmra.mxu1 %vm850_vm2, %v826_v20  ;;  %v1734_v33 = vld [vmem:[%s2402_s18] ss:$0 sm:$0xff] }
 0x170   : > { %1804 = vmatprep.mubr.msk.bf16.mxu1 %vm1986_vm1, %v1985_v17  ;;  %s2408_s3 = scalar_lea.vmem %s2407_s30, %s2125_s20 }
 0x171   : > { %p1758_p8 = scmp.ne.s32.totalorder %s2410_s27, 1 }
 0x172   : > { %s2411_s2 = sld [smem:[#allocation19_spill]] (!%p1758_p8) }
 0x173   : > { %s2412_s23 = sld [smem:[#allocation20_spill]] (!%p1758_p8) }
 0x22f   : > { %v888_v22 = vpop.f32.mrf.mxu1 }
 0x230   : > { %v889_v23 = vadd.f32 %v1730_v21, %v888_v22 }
 0x231   : > { %v1800_v24 = vpop.f32.mrf.mxu1 }
 0x232   : > { %v905_v25 = vpack.c.bf16 %v889_v23, %v889_v23 }
 0x233   : > { %v891_v26 = vpop.f32.mrf.mxu1 }
 0x234   : > { %1019 = vrot.lane.b32.xlu1 %v905_v25, %s1987_s21  ;;  %907 = vrot.lane.b32.xlu0 %v905_v25, %s1988_s29 }
 0x235   : > { %v1801_v27 = vpop.f32.mrf.mxu1 }
 0x238   : > { %1021 = vrot.lane.b32.xlu0 %v905_v25, %s1989_s0 }
 0x2a6   : > { %v908_v28 = vpop.permute.xlu0 %907  ;;  %v1020_v32 = vpop.permute.xlu1 %1019 }
 0x2a7   : > { %v914_v29 = vsel %vm909_vm3, %v908_v28, 0 }
 0x2a8   : > { %1803 = vmatpush3.bf16.xpose.msra.mxu1 %v914_v29 }
 0x2a9   : > { %1814 = vmatprep.subr.bf16.mxu1 %v1985_v17 }
 0x2aa   : > { %v1022_v30 = vpop.permute.xlu0 %1021 }
 0x2ab   : > { %v1027_v31 = vsel %vm909_vm3, %v1022_v30, 0 }
 0x2af   : > { %1805 = vmatmul.mubr.msk.bf16.vlgmr.msra.gmra.mxu1 %vm909_vm3, %v905_v25 }
 0x2b0   : > { %1815 = vmatpush3.bf16.xpose.msra.mxu1 %v1027_v31  ;;  %1816 = vmatprep.mubr.msk.bf16.mxu1 %vm1986_vm1, %v1985_v17 }
 0x2b1   : > { %1826 = vmatprep.subr.bf16.mxu1 %v1985_v17 }
 0x2b7   : > { %1817 = vmatmul.mubr.msk.bf16.vlgmr.msra.gmra.mxu1 %vm909_vm3, %v1020_v32 }
 0x2b8   : > { %1828 = vmatprep.mubr.msk.bf16.mxu1 %vm1986_vm1, %v1985_v17  ;;  %1827 = vmatpush3.bf16.msra.mxu1 %v1920_v5 }
 0x2b9   : > { %1838 = vmatprep.subr.bf16.mxu1 %v1985_v17 }
 0x36f   : > { %v950_v34 = vpop.f32.mrf.mxu1 }
 0x370   : > { %v951_v35 = vadd.f32 %v1734_v33, %v950_v34 }
 0x371   : > { %v1806_v36 = vpop.f32.mrf.mxu1 }
 0x372   : > { %v957_v37 = vsel %vm956_vm4, %v951_v35, -inf  ;;  %v1921_v36 = vld [vmem:[%s2165_s16 + $0x8] sm:$0xff]  }
 0x373   : > { %958 = vmax.xlane.f32.xlu1 %v957_v37  ;;  %v953_v38 = vpop.f32.mrf.mxu1  ;;  %v1922_v37 = vld [vmem:[%s2165_s16] sm:$0xff]   ;;  %s2405_s16 = sld [smem:[#allocation15_spill]] }
 0x375   : > { %v1807_v39 = vpop.f32.mrf.mxu1 }
 0x377   : > { %v1063_v40 = vpop.f32.mrf.mxu1 }
 0x378   : > { %v1064_v41 = vadd.f32 %v1734_v33, %v1063_v40 }
 0x379   : > { %v1818_v42 = vpop.f32.mrf.mxu1  ;;  %s2406_s21 = scalar_lea.vmem %s2405_s16, %s2125_s20 }
 0x37a   : > { %v1069_v43 = vsel %vm956_vm4, %v1064_v41, -inf }
 0x37b   : > { %1070 = vmax.xlane.f32.xlu0 %v1069_v43  ;;  %v1066_v44 = vpop.f32.mrf.mxu1  ;;  %v1745_v43 = vld [vmem:[%s2406_s21] ss:$0 sm:$0xff] }
 0x37d   : > { %v1819_v45 = vpop.f32.mrf.mxu1 }
 0x3fc   : > { %v959_v46 = vpop.xlane.xlu1 %958 }
 0x3fd   : > { %v960_v47 = vsub.f32 %v951_v35, %v959_v46 }
 0x3ff   : > { %v961_v48 = vmul.f32 1.442695, %v960_v47  ;;  %v1923_v47 = vld [vmem:[%s2179_s26 + $0x18] sm:$0xff]  }
 0x401   : > { %1927 = vpow2.f32 %v961_v48  ;;  %v1924_v48 = vld [vmem:[%s2179_s26 + $0x10] sm:$0xff]  }
 0x404   : > { %v1071_v49 = vpop.xlane.xlu0 %1070 }
 0x405   : > { %v1072_v50 = vsub.f32 %v1064_v41, %v1071_v49  ;;  %v1744_v41 = vld [vmem:[%s2404_s17] ss:$0 sm:$0xff]  ;;  %v1925_v49 = vld [vmem:[%s2179_s26 + $0x8] sm:$0xff]  }
 0x407   : > { %v1073_v51 = vmul.f32 1.442695, %v1072_v50  ;;  %v1926_v50 = vld [vmem:[%s2179_s26] sm:$0xff]  }
 0x409   : > { %1929 = vpow2.f32 %v1073_v51  ;;  %v1746_v51 = vld [vmem:[%s2408_s3] ss:$0 sm:$0xff] }
 0x40e   : > { %v1928_v52 = vpop.eup %1927 }
 0x40f   : > { %v963_v53 = vsel %vm956_vm4, %v1928_v52, 0.0 }
 0x410   : > { %964 = vadd.xlane.f32.xlu0 %v963_v53 }
 0x416   : > { %v1930_v54 = vpop.eup %1929 }
 0x417   : > { %v1075_v55 = vsel %vm956_vm4, %v1930_v54, 0.0 }
 0x418   : > { %1076 = vadd.xlane.f32.xlu1 %v1075_v55 }
 0x426   : > { %969 = vrot.lane.b32.xlu0 %v905_v25, %s1990_s6 }
 0x429   : > { %1081 = vrot.lane.b32.xlu1 %v905_v25, %s1991_s9  ;;  %v1743_v25 = vld [vmem:[%s2403_s19] ss:$0 sm:$0xff] }
 0x499   : > { %v965_v56 = vpop.xlane.xlu0 %964 }
 0x49a   : > { %1931 = vrcp.f32 %v965_v56 }
 0x49d   : > { %v970_v57 = vpop.permute.xlu0 %969 }
 0x49e   : > { %v976_v58 = vsel %vm974_vm5, %v970_v57, 0 }
 0x49f   : > { %1809 = vmatpush3.bf16.msra.mxu0 %v976_v58 }
 0x4a0   : > { %1820 = vmatprep.subr.bf16.mxu0 %v1985_v17 }
 0x4a1   : > { %v1077_v59 = vpop.xlane.xlu1 %1076 }
 0x4a2   : > { %1933 = vrcp.f32 %v1077_v59 }
 0x4a5   : > { %v1082_v62 = vpop.permute.xlu1 %1081 }
 0x4a6   : > { %v1087_v0 = vsel %vm974_vm5, %v1082_v62, 0 }
 0x4a7   : > { %v1932_v60 = vpop.eup %1931 }
 0x4a8   : > { %v967_v61 = vmul.f32 %v1932_v60, %v1928_v52 }
 0x4aa   : > { %v968_v63 = vpack.c.bf16 %v967_v61, %v967_v61 }
 0x4ac   : > { %1811 = vmatmul.mubr.msk.bf16.vlgmr.msra.gmra.mxu0 %vm956_vm4, %v968_v63 }
 0x4ad   : > { %1821 = vmatpush3.bf16.msra.mxu0 %v1087_v0  ;;  %1822 = vmatprep.mubr.msk.bf16.mxu0 %vm1986_vm1, %v1985_v17 }
 0x4ae   : > { %1832 = vmatprep.subr.bf16.mxu0 %v1985_v17 }
 0x4af   : > { %v1934_v1 = vpop.eup %1933 }
 0x4b0   : > { %v1079_v2 = vmul.f32 %v1934_v1, %v1930_v54 }
 0x4b2   : > { %v1080_v3 = vpack.c.bf16 %v1079_v2, %v1079_v2  ;;  %v1750_v2 = vld [vmem:[%s777_s25] ss:$0 sm:$0xff] }
 0x4b4   : > { %1823 = vmatmul.mubr.msk.bf16.vlgmr.msra.gmra.mxu0 %vm956_vm4, %v1080_v3 }
 0x4b5   : > { %1834 = vmatprep.mubr.msk.bf16.mxu0 %vm1986_vm1, %v1985_v17  ;;  %1833 = vmatpush3.bf16.msra.mxu0 %v1919_v4 }
 0x4b6   : > { %1846 = vmatprep.subr.bf16.mxu0 %v1985_v17 }
 0x56c   : > { %v1012_v6 = vpop.f32.mrf.mxu0 }
 0x56d   : > { %v1018_v7 = vpack.c.bf16 %v1012_v6, %v1012_v6 }
 0x56e   : > { %v1812_v8 = vpop.f32.mrf.mxu0 }
 0x56f   : > { %1835 = vmatmul.mubr.msk.bf16.vlgmr.msra.gmra.mxu0 %vm909_vm3, %v1018_v7 }
 0x570   : > { %v1015_v9 = vpop.f32.mrf.mxu0  ;;  %1854 = vmatprep.mubr.msk.bf16.mxu0 %vm1986_vm1, %v1985_v17  ;;  %1847 = vmatpush3.bf16.msra.mxu0 %v1923_v47 }
 0x571   : > { %1848 = vmatprep.subr.bf16.mxu0 %v1985_v17 }
 0x572   : > { %v1813_v10 = vpop.f32.mrf.mxu0 }
 0x574   : > { %v1123_v11 = vpop.f32.mrf.mxu0  ;;  %1849 = vmatpush3.bf16.msra.mxu0 %v1924_v48 }
 0x575   : > { %v1129_v12 = vpack.c.bf16 %v1123_v11, %v1123_v11  ;;  %1850 = vmatprep.subr.bf16.mxu0 %v1985_v17 }
 0x576   : > { %v1824_v13 = vpop.f32.mrf.mxu0 }
 0x577   : > { %1829 = vmatmul.mubr.msk.bf16.vlgmr.msra.gmra.mxu1 %vm909_vm3, %v1129_v12 }
 0x578   : > { %v1126_v14 = vpop.f32.mrf.mxu0  ;;  %1842 = vmatprep.mubr.msk.bf16.mxu1 %vm1986_vm1, %v1985_v17  ;;  %1839 = vmatpush3.bf16.msra.mxu1 %v1921_v36 }
 0x579   : > { %1840 = vmatprep.subr.bf16.mxu1 %v1985_v17  ;;  %1851 = vmatpush3.bf16.msra.mxu0 %v1925_v49 }
 0x57a   : > { %v1825_v15 = vpop.f32.mrf.mxu0  ;;  %1852 = vmatprep.subr.bf16.mxu0 %v1985_v17 }
 0x57c   : > { %1841 = vmatpush3.bf16.msra.mxu1 %v1922_v37 }
 0x57d   : > { %1853 = vmatpush3.bf16.msra.mxu0 %v1926_v50 }
 0x62f   : > { %v1222_v16 = vpop.f32.mrf.mxu0 }
 0x631   : > { %v1836_v18 = vpop.f32.mrf.mxu0 }
 0x633   : > { %v1225_v20 = vpop.f32.mrf.mxu0 }
 0x635   : > { %v1837_v21 = vpop.f32.mrf.mxu0 }
 0x636   : > { %v1756_v21 = vld [vmem:[%s780_s4] ss:$0 sm:$0xff] }
 0x637   : > { %v1173_v22 = vpop.f32.mrf.mxu1 }
 0x638   : > { %v1223_v23 = vadd.f32 %v1222_v16, %v1173_v22 }
 0x639   : > { %v1830_v24 = vpop.f32.mrf.mxu1 }
 0x63a   : > { %v1228_v26 = vadd.f32 %v1223_v23, %v2209_v19  ;;  %v1757_v23 = vld [vmem:[%s783_s10] ss:$0 sm:$0xff] }
 0x63b   : > { %v1176_v27 = vpop.f32.mrf.mxu1 }
 0x63c   : > { %v1236_v28 = vadd.f32 %v1743_v25, %v1228_v26 }
 0x63d   : > { %v1831_v29 = vpop.f32.mrf.mxu1 }
 0x63e   : > { %v1239_v30 = vsel %vm850_vm2, %v1236_v28, 0.0 }
 0x63f   : > { %1240 = vadd.xlane.f32.xlu1 %v1239_v30 }
 0x6c8   : > { %v1241_v31 = vpop.xlane.xlu1 %1240 }
 0x6c9   : > { %v1243_v32 = vmul.f32 0.03125, %v1241_v31 }
 0x6cb   : > { %v1244_v33 = vsub.f32 %v1236_v28, %v1243_v32 }
 0x6cd   : > { %v1245_v34 = vmul.f32 %v1244_v33, %v1244_v33 }
 0x6cf   : > { %v1246_v35 = vsel %vm850_vm2, %v1245_v34, 0.0 }
 0x6d0   : > { %1247 = vadd.xlane.f32.xlu0 %v1246_v35 }
 0x759   : > { %v1248_v19 = vpop.xlane.xlu0 %1247 }
 0x75a   : > { %v1249_v38 = vmul.f32 0.03125, %v1248_v19 }
 0x75c   : > { %v1250_v39 = vadd.f32 1e-12, %v1249_v38 }
 0x75e   : > { %1935 = vrsqrt.f32 %v1250_v39 }
 0x76b   : > { %v1936_v40 = vpop.eup %1935 }
 0x76c   : > { %v1252_v42 = vmul.f32 %v1936_v40, %v1244_v33 }
 0x76e   : > { %v1259_v44 = vmul.f32 %v1744_v41, %v1252_v42 }
 0x770   : > { %v1266_v45 = vadd.f32 %v1745_v43, %v1259_v44 }
 0x772   : > { %v1267_v46 = vpack.c.bf16 %v1266_v45, %v1266_v45 }
 0x774   : > { %1843 = vmatmul.mubr.msk.bf16.vlgmr.msra.gmra.mxu1 %vm850_vm2, %v1267_v46 }
 0x834   : > { %v1328_v52 = vpop.f32.mrf.mxu1 }
 0x835   : > { %v1329_v53 = vadd.f32 %v1746_v51, %v1328_v52 }
 0x836   : > { %v1844_v54 = vpop.f32.mrf.mxu1 }
 0x837   : > { %v1335_v55 = vmul.f32 0.044715, %v1329_v53  ;;  %v1334_v17 = vmul.f32 0.5, %v1329_v53 }
 0x838   : > { %v1331_v56 = vpop.f32.mrf.mxu1 }
 0x839   : > { %v1336_v57 = vmul.f32 %v1335_v55, %v1329_v53 }
 0x83a   : > { %v1845_v58 = vpop.f32.mrf.mxu1 }
 0x83b   : > { %v1337_v59 = vmul.f32 %v1336_v57, %v1329_v53 }
 0x83d   : > { %v1338_v60 = vadd.f32 %v1337_v59, %v1329_v53 }
 0x83f   : > { %v1339_v61 = vmul.f32 0.7978846, %v1338_v60 }
 0x841   : > { %1937 = vtanh.f32 %v1339_v61 }
 0x84e   : > { %v1938_v62 = vpop.eup %1937 }
 0x84f   : > { %v1341_v63 = vadd.f32 1.0, %v1938_v62 }
 0x851   : > { %v1342_v0 = vmul.f32 %v1341_v63, %v1334_v17 }
 0x853   : > { %v1343_v1 = vpack.c.bf16 %v1342_v0, %v1342_v0 }
 0x855   : > { %1855 = vmatmul.mubr.msk.bf16.vlgmr.msra.gmra.mxu0 %vm1383_vm6, %v1343_v1 }
 0x915   : > { %v1421_v3 = vpop.f32.mrf.mxu0 }
 0x916   : > { %v1422_v4 = vadd.f32 %v1750_v2, %v1421_v3 }
 0x917   : > { %v1856_v5 = vpop.f32.mrf.mxu0 }
 0x918   : > { %v1427_v6 = vadd.f32 %v1422_v4, %v1266_v45 }
 0x919   : > { %v1424_v7 = vpop.f32.mrf.mxu0 }
 0x91a   : > { %v1430_v8 = vsel %vm850_vm2, %v1427_v6, 0.0 }
 0x91b   : > { %1431 = vadd.xlane.f32.xlu0 %v1430_v8  ;;  %v1857_v9 = vpop.f32.mrf.mxu0 }
 0x9a4   : > { %v1432_v10 = vpop.xlane.xlu0 %1431 }
 0x9a5   : > { %v1433_v11 = vmul.f32 0.03125, %v1432_v10 }
 0x9a7   : > { %v1434_v12 = vsub.f32 %v1427_v6, %v1433_v11 }
 0x9a9   : > { %v1435_v13 = vmul.f32 %v1434_v12, %v1434_v12 }
 0x9ab   : > { %v1436_v14 = vsel %vm850_vm2, %v1435_v13, 0.0 }
 0x9ac   : > { %1437 = vadd.xlane.f32.xlu1 %v1436_v14 }
 0xa35   : > { %v1438_v15 = vpop.xlane.xlu1 %1437 }
 0xa36   : > { %v1439_v16 = vmul.f32 0.03125, %v1438_v15 }
 0xa38   : > { %v1440_v18 = vadd.f32 1e-12, %v1439_v16 }
 0xa3a   : > { %1939 = vrsqrt.f32 %v1440_v18 }
 0xa47   : > { %v1940_v20 = vpop.eup %1939 }
 0xa48   : > { %v1442_v22 = vmul.f32 %v1940_v20, %v1434_v12 }
 0xa4a   : > { %v1449_v24 = vmul.f32 %v1756_v21, %v1442_v22  ;;  %1461 = sbr.rel (%p1758_p8) target bundleno = 2858 (0xb2a), region = 100 }
 0xa4c   : > { %v1456_v25 = vadd.f32 %v1757_v23, %v1449_v24 }
 0xa4e   : > { %1457 = vst.msk [vmem:[#allocation2] sm:$0xff] %vm850_vm2, %v1456_v25 }
 0xa4f   : > { %v1941_v26 = vld [vmem:[%s2411_s2 + $0x8] sm:$0xff]   ;;  %v1992_v27 = vmov 0.0   ;;  %v1942_v28 = vld [vmem:[%s2411_s2] sm:$0xff]   ;;  %vm1993_vm7 = vmmov 0   ;;  %v1462_v29 = vpack.c.bf16 %v1456_v25, %v1456_v25  ;;  %vm1524_vm8 = vcmask 253952  }
 0xa50   : > { %1858 = vmatprep.subr.bf16.mxu0 %v1992_v27  ;;  %1862 = vmatprep.mubr.msk.bf16.mxu0 %vm1993_vm7, %v1992_v27  ;;  %v1467_v30 = vld [vmem:[%s2412_s23] sm:$0x1] }
 0xa51   : > { %1859 = vmatpush3.bf16.msra.mxu0 %v1941_v26 }
 0xa52   : > { %1860 = vmatprep.subr.bf16.mxu0 %v1992_v27 }
 0xa55   : > { %1861 = vmatpush3.bf16.msra.mxu0 %v1942_v28 }
 0xa58   : > { %1863 = vmatmul.mubr.msk.bf16.vlgmr.msra.gmra.mxu0 %vm850_vm2, %v1462_v29 }
 0xb18   : > { %v1517_v31 = vpop.f32.mrf.mxu0 }
 0xb19   : > { %v1518_v32 = vadd.f32 %v1517_v31, %v1467_v30 }
 0xb1a   : > { %v1864_v33 = vpop.f32.mrf.mxu0 }
 0xb1b   : > { %1943 = vtanh.f32 %v1518_v32 }
 0xb1c   : > { %v1520_v34 = vpop.f32.mrf.mxu0 }
 0xb1e   : > { %v1865_v35 = vpop.f32.mrf.mxu0 }
 0xb28   : > { %v1944_v36 = vpop.eup %1943 }
 0xb29   : > { %1525 = vst.msk [vmem:[%s786_s11] sm:$0x1] %vm1524_vm8, %v1944_v36 }
 0xb2a PF: > { %s2414_s29 = sld [smem:[#allocation6_spill]] }
 0xb2b   : > { %s2415_s27 = sld [smem:[#allocation4_spill]] }
 0xb2c   : > { %s2416_s28 = sld [smem:[#allocation5_spill]] }
 0xb2d   : > { %s2418_s30 = sld [smem:[#allocation8_spill]] }
 0xb30   : > { %s28_s0 = sadd.s32 1, %s2414_s29   ;;  %s2417_s29 = sld [smem:[#allocation7_spill]] }
 0xb31   : > { %p25_p9 = scmp.ge.s32.totalorder %s28_s0, 6  }
 0xb33   :  { %27 = sbr.rel (!%p25_p9) target bundleno = 14 (0xe), region = 169 }

</bundles_post_ra>
